<compile_context>
chip_gen: v7x
topology: tpu7x:2x2x1
jax: 0.10.0
libtpu: 0.0.40
codegen_flags: <defaults>
</compile_context>

<pallas_src>
import functools

import jax
import jax.numpy as jnp
from jax.experimental import pallas as pl
from jax.experimental.pallas import tpu as pltpu

LANES = 128
SUBLANES = 8
VREG = SUBLANES * LANES  # 1024 elements


@functools.lru_cache(maxsize=1)
def _chip_config():
    """Return (rows_per_tile, max_cores, core_axis_semantics) per TPU generation."""
    try:
        kind = jax.devices()[0].device_kind.lower()
    except Exception:  # defensive: fall back to conservative settings
        kind = ""
    if "v7" in kind or "tpu7" in kind:
        # v7x: 3.2 TB/s HBM per TC, 64 MiB VMEM, 2 TCs/chip.
        # 8192x128 f32 = 4 MiB per input per buffer -> 16 MiB double-buffered.
        return 8192, 2, getattr(pltpu, "CORE_PARALLEL", "parallel")
    if "v6" in kind:
        # v6e: 32 MiB default scoped VMEM; 2 MiB/input/buffer -> 8 MiB total.
        return 4096, 1, "parallel"
    # v5e / unknown: 16 MiB default scoped VMEM; 1 MiB/input/buffer -> 4 MiB.
    return 2048, 1, "parallel"


def _wl1_kernel(x_ref, t_ref, o_ref, *, rows_valid, block_rows):
    c = pl.program_id(0)   # core axis (size 1 except on v7x)
    i = pl.program_id(1)   # sequential reduction axis

    # Output block is resident across the inner axis: it is the accumulator.
    @pl.when(i == 0)
    def _():
        o_ref[...] = jnp.zeros_like(o_ref)

    logical_tile = c * pl.num_programs(1) + i
    # A block is fully valid iff it ends on or before the last valid row.
    full_block = (logical_tile + 1) * block_rows <= rows_valid

    def fold(v):
        # Fold the block to one (8, 128) vreg with pure VPU adds (no XLU work).
        return jnp.sum(v.reshape(block_rows // SUBLANES, SUBLANES, LANES), axis=0)

    @pl.when(full_block)
    def _():
        # Steady-state fast path: no iota / compare / select per element.
        x = x_ref[...].astype(jnp.float32)
        t = t_ref[...].astype(jnp.float32)
        o_ref[...] += fold(jnp.abs(x - t) * jnp.exp2(t))

    @pl.when(jnp.logical_not(full_block))
    def _():
        # Taken for at most one ragged tail block per core (plus clamped
        # duplicate blocks on v7x).  Single post-compute select zeroes invalid
        # rows; garbage in the partial-DMA region cannot leak through a select.
        x = x_ref[...].astype(jnp.float32)
        t = t_ref[...].astype(jnp.float32)
        loss = jnp.abs(x - t) * jnp.exp2(t)
        row_ids = jax.lax.broadcasted_iota(jnp.int32, (block_rows, LANES), 0)
        mask = (logical_tile * block_rows + row_ids) < rows_valid
        o_ref[...] += fold(jnp.where(mask, loss, 0.0))


def weighted_l1_loss(inp, target, reduction="sum"):
    if reduction not in ("sum", "mean"):
        raise ValueError(f"unsupported reduction: {reduction!r}")
    assert inp.shape == target.shape, "input/target must have matching shapes"
    n_elem = inp.size

    # Flatten in native dtype (free reshape; cast to f32 happens in-kernel,
    # which halves HBM traffic for bf16 inputs).
    x = jnp.ravel(inp)
    t = jnp.ravel(target)

    # Kernel streams the 1024-aligned prefix; the <=1023-element unaligned tail
    # is folded in with plain JAX (no wrapper-side jnp.pad copies).
    n_main = (n_elem // VREG) * VREG
    tail = jnp.float32(0.0)
    if n_main != n_elem:
        xt = x[n_main:].astype(jnp.float32)
        tt = t[n_main:].astype(jnp.float32)
        tail = jnp.sum(jnp.abs(xt - tt) * jnp.exp2(tt))

    if n_main == 0:
        loss = tail
    else:
        rows_per_tile, max_cores, core_sem = _chip_config()

        rows = n_main // LANES                   # multiple of 8
        x2 = x[:n_main].reshape(rows, LANES)     # no-op slice when already aligned
        t2 = t[:n_main].reshape(rows, LANES)

        block_rows = min(rows_per_tile, rows)    # multiple of 8
        n_tile_blocks = pl.cdiv(rows, block_rows)
        num_cores = min(max_cores, n_tile_blocks)
        tiles_per_core = pl.cdiv(n_tile_blocks, num_cores)

        def in_map(c, i):
            # Clamp so no DMA starts wholly past the array; clamped duplicate
            # blocks (v7x, odd block counts) are zeroed by the in-kernel mask.
            return (jnp.minimum(c * tiles_per_core + i, n_tile_blocks - 1), 0)

        itemsize = jnp.dtype(x2.dtype).itemsize
        cost = pl.CostEstimate(
            flops=4 * n_main,
            transcendentals=n_main,
            bytes_accessed=2 * n_main * itemsize + num_cores * VREG * 4,
        )

        partials = pl.pallas_call(
            functools.partial(_wl1_kernel, rows_valid=rows, block_rows=block_rows),
            out_shape=jax.ShapeDtypeStruct((num_cores * SUBLANES, LANES), jnp.float32),
            grid_spec=pltpu.PrefetchScalarGridSpec(
                num_scalar_prefetch=0,
                grid=(num_cores, tiles_per_core),
                in_specs=[
                    pl.BlockSpec((block_rows, LANES), in_map),
                    pl.BlockSpec((block_rows, LANES), in_map),
                ],
                out_specs=pl.BlockSpec((SUBLANES, LANES), lambda c, i: (c, 0)),
            ),
            compiler_params=pltpu.CompilerParams(
                dimension_semantics=(core_sem, "arbitrary"),
            ),
            cost_estimate=cost,
        )(x2, t2)

        # Single cross-lane/cross-sublane reduction, done once outside the kernel.
        loss = jnp.sum(partials) + tail

    if reduction == "mean":
        loss = loss / jnp.float32(n_elem)
    return loss


if __name__ == "__main__":
    key = jax.random.PRNGKey(0)
    k1, k2, k3, k4 = jax.random.split(key, 4)

    # Small NCHW-like inputs (single full block -> fast path).
    x = jax.random.normal(k1, (2, 4, 16, 16), dtype=jnp.float32)
    y = jax.random.normal(k2, (2, 4, 16, 16), dtype=jnp.float32)

    loss = weighted_l1_loss(x, y, reduction="sum")
    jax.block_until_ready(loss)
    ref = jnp.sum(jnp.abs(x - y) * (2.0 ** y))
    assert jnp.allclose(loss, ref, rtol=1e-5, atol=1e-5), (loss, ref)

    loss_mean = weighted_l1_loss(x, y, reduction="mean")
    ref_mean = jnp.mean(jnp.abs(x - y) * (2.0 ** y))
    assert jnp.allclose(loss_mean, ref_mean, rtol=1e-5, atol=1e-5), (loss_mean, ref_mean)

    # Medium unaligned input: exercises the masked ragged-tail block and the
    # plain-JAX <1024-element tail fold on every TPU generation.
    xm = jax.random.normal(k3, (1200, 1000), dtype=jnp.float32)
    ym = jax.random.normal(k4, (1200, 1000), dtype=jnp.float32)
    loss_m = weighted_l1_loss(xm, ym, reduction="sum")
    jax.block_until_ready(loss_m)
    ref_m = jnp.sum(jnp.abs(xm - ym) * (2.0 ** ym))
    assert jnp.allclose(loss_m, ref_m, rtol=2e-4, atol=1e-2), (loss_m, ref_m)

    print("KERNEL_OK")
</pallas_src>

<mosaic_0001>
module attributes {stable_mosaic.version = 11 : i64} {
  func.func @_wl1_kernel(%arg0: i32, %arg1: i32, %arg2: memref<16x128xf32, #tpu.memory_space<vmem>>, %arg3: memref<16x128xf32, #tpu.memory_space<vmem>>, %arg4: memref<8x128xf32, #tpu.memory_space<vmem>>) attributes {dimension_semantics = [#tpu.dimension_semantics<parallel>, #tpu.dimension_semantics<arbitrary>], iteration_bounds = array<i64: 1, 1>, scalar_prefetch = 0 : i64, scratch_operands = 0 : i64, tpu.core_type = #tpu.core_type<tc>, window_params = [{transform_indices = @transform_0, window_bounds = array<i64: 16, 128>}, {transform_indices = @transform_1, window_bounds = array<i64: 16, 128>}, {transform_indices = @transform_2, window_bounds = array<i64: 8, 128>}]} {
    %c0_i32 = arith.constant 0 : i32
    %0 = arith.cmpi eq, %arg1, %c0_i32 : i32
    %1 = arith.extui %0 : i1 to i32
    %c0_i32_0 = arith.constant 0 : i32
    %2 = arith.cmpi ne, %1, %c0_i32_0 : i32
    scf.if %2 {
      %cst = arith.constant 0.000000e+00 : f32
      %13 = vector.broadcast %cst : f32 to vector<8x128xf32>
      %c0 = arith.constant 0 : index
      %c0_5 = arith.constant 0 : index
      %14 = vector.load %arg4[%c0, %c0_5] : memref<8x128xf32, #tpu.memory_space<vmem>>, vector<8x128xf32>
      tpu.vector_store %arg4[%c0, %c0_5], %13 {strides = array<i32>} : memref<8x128xf32, #tpu.memory_space<vmem>>, vector<8x128xf32>,
    } else {
    }
    %c1_i32 = arith.constant 1 : i32
    %3 = arith.muli %arg0, %c1_i32 : i32
    %4 = arith.addi %3, %arg1 : i32
    %c1_i32_1 = arith.constant 1 : i32
    %5 = arith.addi %4, %c1_i32_1 : i32
    %c16_i32 = arith.constant 16 : i32
    %6 = arith.muli %5, %c16_i32 : i32
    %c16_i32_2 = arith.constant 16 : i32
    %7 = arith.cmpi sle, %6, %c16_i32_2 : i32
    %8 = arith.extui %7 : i1 to i32
    %c0_i32_3 = arith.constant 0 : i32
    %9 = arith.cmpi ne, %8, %c0_i32_3 : i32
    scf.if %9 {
      %c0 = arith.constant 0 : index
      %c0_5 = arith.constant 0 : index
      %13 = vector.load %arg2[%c0, %c0_5] : memref<16x128xf32, #tpu.memory_space<vmem>>, vector<16x128xf32>
      %c0_6 = arith.constant 0 : index
      %c0_7 = arith.constant 0 : index
      %14 = vector.load %arg3[%c0_6, %c0_7] : memref<16x128xf32, #tpu.memory_space<vmem>>, vector<16x128xf32>
      %c0_8 = arith.constant 0 : index
      %c0_9 = arith.constant 0 : index
      %15 = vector.load %arg4[%c0_8, %c0_9] : memref<8x128xf32, #tpu.memory_space<vmem>>, vector<8x128xf32>
      %16 = arith.subf %13, %14 : vector<16x128xf32>
      %17 = math.absf %16 : vector<16x128xf32>
      %18 = math.exp2 %14 : vector<16x128xf32>
      %19 = arith.mulf %17, %18 : vector<16x128xf32>
      %20 = vector.shape_cast %19 : vector<16x128xf32> to vector<2x8x128xf32>
      %cst = arith.constant dense<0.000000e+00> : vector<8x128xf32>
      %21 = vector.multi_reduction <add>, %20, %cst [0] : vector<2x8x128xf32> to vector<8x128xf32>
      %22 = arith.addf %15, %21 : vector<8x128xf32>
      %c0_10 = arith.constant 0 : index
      %c0_11 = arith.constant 0 : index
      %23 = vector.load %arg4[%c0_10, %c0_11] : memref<8x128xf32, #tpu.memory_space<vmem>>, vector<8x128xf32>
      tpu.vector_store %arg4[%c0_10, %c0_11], %22 {strides = array<i32>} : memref<8x128xf32, #tpu.memory_space<vmem>>, vector<8x128xf32>,
    } else {
    }
    %true = arith.constant true
    %10 = arith.xori %7, %true : i1
    %11 = arith.extui %10 : i1 to i32
    %c0_i32_4 = arith.constant 0 : i32
    %12 = arith.cmpi ne, %11, %c0_i32_4 : i32
    scf.if %12 {
      %c0 = arith.constant 0 : index
      %c0_5 = arith.constant 0 : index
      %13 = vector.load %arg2[%c0, %c0_5] : memref<16x128xf32, #tpu.memory_space<vmem>>, vector<16x128xf32>
      %c0_6 = arith.constant 0 : index
      %c0_7 = arith.constant 0 : index
      %14 = vector.load %arg3[%c0_6, %c0_7] : memref<16x128xf32, #tpu.memory_space<vmem>>, vector<16x128xf32>
      %15 = arith.subf %13, %14 : vector<16x128xf32>
      %16 = math.absf %15 : vector<16x128xf32>
      %17 = math.exp2 %14 : vector<16x128xf32>
      %18 = arith.mulf %16, %17 : vector<16x128xf32>
      %19 = tpu.iota {dimensions = array<i32: 0>} : vector<16x128xi32>
      %c16_i32_8 = arith.constant 16 : i32
      %20 = arith.muli %4, %c16_i32_8 : i32
      %21 = vector.broadcast %20 : i32 to vector<16x128xi32>
      %22 = arith.addi %21, %19 : vector<16x128xi32>
      %c16_i32_9 = arith.constant 16 : i32
      %23 = vector.broadcast %c16_i32_9 : i32 to vector<16x128xi32>
      %24 = arith.cmpi slt, %22, %23 : vector<16x128xi32>
      %c0_10 = arith.constant 0 : index
      %c0_11 = arith.constant 0 : index
      %25 = vector.load %arg4[%c0_10, %c0_11] : memref<8x128xf32, #tpu.memory_space<vmem>>, vector<8x128xf32>
      %cst = arith.constant 0.000000e+00 : f32
      %26 = vector.broadcast %cst : f32 to vector<16x128xf32>
      %27 = arith.select %24, %18, %26 : vector<16x128xi1>, vector<16x128xf32>
      %28 = vector.shape_cast %27 : vector<16x128xf32> to vector<2x8x128xf32>
      %cst_12 = arith.constant dense<0.000000e+00> : vector<8x128xf32>
      %29 = vector.multi_reduction <add>, %28, %cst_12 [0] : vector<2x8x128xf32> to vector<8x128xf32>
      %30 = arith.addf %25, %29 : vector<8x128xf32>
      %c0_13 = arith.constant 0 : index
      %c0_14 = arith.constant 0 : index
      %31 = vector.load %arg4[%c0_13, %c0_14] : memref<8x128xf32, #tpu.memory_space<vmem>>, vector<8x128xf32>
      tpu.vector_store %arg4[%c0_13, %c0_14], %30 {strides = array<i32>} : memref<8x128xf32, #tpu.memory_space<vmem>>, vector<8x128xf32>,
    } else {
    }
    return
  }
  func.func @transform_0(%arg0: i32, %arg1: i32) -> (i32, i32) {
    %c1_i32 = arith.constant 1 : i32
    %0 = arith.muli %arg0, %c1_i32 : i32
    %1 = arith.addi %0, %arg1 : i32
    %c0_i32 = arith.constant 0 : i32
    %2 = arith.minsi %1, %c0_i32 : i32
    %c0_i32_0 = arith.constant 0 : i32
    %c0_i32_1 = arith.constant 0 : i32
    return %2, %c0_i32_0 : i32, i32
  }
  func.func @transform_1(%arg0: i32, %arg1: i32) -> (i32, i32) {
    %c1_i32 = arith.constant 1 : i32
    %0 = arith.muli %arg0, %c1_i32 : i32
    %1 = arith.addi %0, %arg1 : i32
    %c0_i32 = arith.constant 0 : i32
    %2 = arith.minsi %1, %c0_i32 : i32
    %c0_i32_0 = arith.constant 0 : i32
    %c0_i32_1 = arith.constant 0 : i32
    return %2, %c0_i32_0 : i32, i32
  }
  func.func @transform_2(%arg0: i32, %arg1: i32) -> (i32, i32) {
    %c0_i32 = arith.constant 0 : i32
    %c0_i32_0 = arith.constant 0 : i32
    return %arg0, %c0_i32 : i32, i32
  }
}

</mosaic_0001>

<bundles_post_ra>
// kernel: tpu_custom_call.1
= control target key start
LH: loop header
LB: loop body
LE: loop exit
PB: predicated region body
PF: predicated region fallthrough
CT: control target
= control target key end

     0   :  { %7 = vsyncpa [#allocation3], 0  ;;  %s277_s0 = inlined_call_operand.hbm [shape: f32[16,128], index: 0, kind: input, shape index: {}]   ;;  %s278_s1 = inlined_call_operand.hbm [shape: f32[16,128], index: 1, kind: input, shape index: {}]   ;;  %s279_s2 = inlined_call_operand.hbm [shape: f32[8,128], index: 2, kind: output, shape index: {}]  }
   0x1   :  { %8 = vsyncpa [#allocation6], 0 }
   0x2   :  { %9 = vsyncpa [#allocation4], 0  ;;  %s221_s9 = smov [#allocation2]   ;;  %s149_s13 = scalar_lea.hbm %s277_s0, 256 }
   0x3   :  { %s21_s10 = sshll.u32 %s221_s9, 4  ;;  %p150_p0 = scmp.ne.s32.totalorder %s277_s0, %s149_s13  ;;  %s22_s10 = int_to_ptr.vmem [resolvable:$true] %s21_s10 }
   0x4   :  { %p153_p1 = scmp.lt.u32.totalorder %s149_s13, %s277_s0 }
   0x6   :  { %p155_p2 = pnand %p153_p1, %p150_p0 }
   0x8   :  { %158 = shalt.err (!%p155_p2)
}
   0x9   :  { %s159_s18 = scalar_lea.vmem %s22_s10, 256  ;;  %p164_p4 = scmp.lt.s32.totalorder %s22_s10, %s22_s10 }
   0xa   :  { %p160_p3 = scmp.ne.s32.totalorder %s22_s10, %s159_s18  ;;  %p165_p5 = scmp.lt.s32.totalorder %s159_s18, %s159_s18 }
   0xc   :  { %p166_p6 = por %p165_p5, %p164_p4 }
   0xe   :  { %p167_p7 = pnand %p166_p6, %p160_p3 }
  0x10   :  { %170 = shalt.err (!%p167_p7)
}
  0x11   :  { %s222_s19 = smov 128   ;;  %s223_s20 = smov 8  }
  0x12   :  { %27 = dma.hbm_to_vmem [thread:$0]  %s277_s0, 256, %s22_s10, [#allocation3], %s222_s19, %s222_s19, %s223_s20  }
  0x13   :  { %s224_s23 = smov [#allocation5]   ;;  %s171_s27 = scalar_lea.hbm %s278_s1, 256 }
  0x14   :  { %s39_s24 = sshll.u32 %s224_s23, 4  ;;  %p172_p8 = scmp.ne.s32.totalorder %s278_s1, %s171_s27  ;;  %s40_s24 = int_to_ptr.vmem [resolvable:$true] %s39_s24 }
  0x15   :  { %p175_p9 = scmp.lt.u32.totalorder %s171_s27, %s278_s1 }
  0x17   :  { %p177_p10 = pnand %p175_p9, %p172_p8 }
  0x19   :  { %180 = shalt.err (!%p177_p10)
}
  0x1a   :  { %s181_s4 = scalar_lea.vmem %s40_s24, 256  ;;  %p186_p12 = scmp.lt.s32.totalorder %s40_s24, %s40_s24 }
  0x1b   :  { %p182_p11 = scmp.ne.s32.totalorder %s40_s24, %s181_s4  ;;  %p187_p13 = scmp.lt.s32.totalorder %s181_s4, %s181_s4 }
  0x1d   :  { %p188_p0 = por %p187_p13, %p186_p12 }
  0x1f   :  { %p189_p1 = pnand %p188_p0, %p182_p11 }
  0x21   :  { %192 = shalt.err (!%p189_p1)
}
  0x22   :  { %45 = dma.hbm_to_vmem [thread:$0]  %s278_s1, 256, %s40_s24, [#allocation6], %s222_s19, %s222_s19, %s223_s20  }
  0x23   :  { %215 = dma.done.wait [#allocation3], 256  }
  0x24   :  { %216 = vsyncadd [#allocation3], 4294967040 }
  0x25   :  { %217 = dma.done.wait [#allocation6], 256  }
  0x26   :  { %218 = vsyncadd [#allocation6], 4294967040  ;;  %v74_v0 = vld [vmem:[#allocation5] sm:$0xff]  ;;  %v72_v1 = vld [vmem:[#allocation2] sm:$0xff]  ;;  %s225_s6 = smov [#allocation7]  }
  0x27   :  { %v75_v2 = vld [vmem:[#allocation5 + $0x8] sm:$0xff]  ;;  %145 = vpow2.f32 %v74_v0  ;;  %v73_v3 = vld [vmem:[#allocation2 + $0x8] sm:$0xff]  ;;  %v77_v4 = vsub.f32 %v72_v1, %v74_v0  ;;  %s125_s1 = sshll.u32 %s225_s6, 4  ;;  %s126_s1 = int_to_ptr.vmem [resolvable:$true] %s125_s1 }
  0x28   :  { %147 = vpow2.f32 %v75_v2  ;;  %v78_v5 = vsub.f32 %v73_v3, %v75_v2  ;;  %s193_s7 = scalar_lea.vmem %s126_s1, 128  ;;  %p198_p3 = scmp.lt.s32.totalorder %s126_s1, %s126_s1 }
  0x29   :  { %v79_v6 = vand.u32 2147483647, %v77_v4  ;;  %p194_p2 = scmp.ne.s32.totalorder %s126_s1, %s193_s7  ;;  %p199_p4 = scmp.lt.s32.totalorder %s193_s7, %s193_s7 }
  0x2a   :  { %v80_v7 = vand.u32 2147483647, %v78_v5 }
  0x2b   :  { %p200_p5 = por %p199_p4, %p198_p3 }
  0x2d   :  { %p201_p6 = pnand %p200_p5, %p194_p2 }
  0x31   :  { %v146_v8 = vpop.eup %145 }
  0x32   :  { %v148_v9 = vpop.eup %147  ;;  %v83_v10 = vmul.f32 %v146_v8, %v79_v6 }
  0x33   :  { %v84_v11 = vmul.f32 %v148_v9, %v80_v7 }
  0x35   :  { %v85_v12 = vadd.f32 %v84_v11, %v83_v10 }
  0x37   :  { %87 = vst [vmem:[#allocation7] sm:$0xff] %v85_v12 }
  0x38   :  { %204 = shalt.err (!%p201_p6)
}
  0x39   :  { %s205_s10 = scalar_lea.hbm %s279_s2, 128 }
  0x3a   :  { %p206_p7 = scmp.ne.s32.totalorder %s279_s2, %s205_s10  ;;  %p209_p8 = scmp.lt.u32.totalorder %s205_s10, %s279_s2 }
  0x3c   :  { %p211_p9 = pnand %p209_p8, %p206_p7 }
  0x3e   :  { %214 = shalt.err (!%p211_p9)
}
  0x3f   :  { %128 = dma.vmem_to_hbm [thread:$0]  %s126_s1, 128, %s279_s2, [#allocation4]  }
  0x40   :  { %219 = dma.done.wait [#allocation4], 128  }
  0x41   :  { %220 = vsyncadd [#allocation4], 4294967168 }
  0x42   :  { %132 = vsyncpa [#allocation3], 1 }
  0x43   :  { %133 = vsyncpa [#allocation6], 1 }
  0x44   :  { %134 = vsyncpa [#allocation4], 1 }

</bundles_post_ra>
